<compile_context>
chip_gen: v6e
topology: v6e:2x2x1
jax: 0.10.0
libtpu: 0.0.40
codegen_flags: <defaults>
</compile_context>

<pallas_src>
import functools

import jax
import jax.numpy as jnp
from jax.experimental import pallas as pl
from jax.experimental.pallas import tpu as pltpu


def _conv_bias_relu_kernel(x_ref, w_ref, b_ref, o_ref):
    # x_ref: (RB, W*9*Cin)   bf16 im2col rows (one row per output-pixel-row)
    # w_ref: (W*9*Cin, W*Cout) bf16 block-diagonal shared conv weight (resident)
    # b_ref: (1, W*Cout)     f32 bias tiled along W (lane-dense)
    # o_ref: (RB, W*Cout)    f32 lane-dense output rows
    acc = jnp.dot(x_ref[...], w_ref[...], preferred_element_type=jnp.float32)
    o_ref[...] = jnp.maximum(acc + b_ref[...], 0.0).astype(o_ref.dtype)


def _pick_row_block(rows8, lane_bytes, small_limit=2 * 1024 * 1024, max_block=512):
    """Row-block size over the fused (B*H) axis.

    If the whole lhs is small (< small_limit bytes) use one grid step (rb =
    rows8): on single-TC v5e/v6e extra steps are pure per-step overhead.
    Otherwise pick the largest multiple-of-8 divisor <= max_block that gives a
    grid of >= 2 steps so the BlockSpec pipeline can overlap DMA and compute.
    """
    if rows8 * lane_bytes <= small_limit:
        return rows8
    divs = [d for d in range(8, min(rows8, max_block) + 1, 8) if rows8 % d == 0]
    multi = [d for d in divs if rows8 // d >= 2]
    if multi:
        return max(multi)
    return max(divs) if divs else rows8


def prepare_siamese_params(weight, bias, W):
    """Parameter-setup-time (once, NOT per forward).

    weight: (3, 3, Cin, Cout) f32 HWIO shared conv weight
    bias:   (Cout,) f32
    Returns:
      rhs_bf16: (W*9*Cin, W*Cout) bf16 block-diagonal weight (W folded into N)
      b2:       (1, W*Cout)       f32 bias tiled along W
    """
    KH, KW, Cin, Cout = weight.shape
    K9 = KH * KW * Cin
    w2 = weight.reshape(K9, Cout)                               # (9*Cin, Cout)
    rhs = jnp.einsum('wv,kc->wkvc',
                     jnp.eye(W, dtype=w2.dtype), w2)            # (W,K9,W,Cout)
    rhs_bf16 = rhs.reshape(W * K9, W * Cout).astype(jnp.bfloat16)
    b2 = jnp.tile(bias, W).reshape(1, W * Cout).astype(jnp.float32)
    return rhs_bf16, b2


def _inner_net_pallas(x_nchw, rhs_bf16, b2):
    """Conv2d(k=3, pad=1) + ReLU on a fused (list*batch) NCHW tensor.

    x_nchw:   (B, Cin, H, W) f32      (B = len(x_list) * N, fused)
    rhs_bf16: (W*9*Cin, W*Cout) bf16  precomputed block-diagonal shared weight
    b2:       (1, W*Cout) f32         precomputed tiled bias
    returns   (B, Cout, H, W) f32
    """
    B, Cin, H, W = x_nchw.shape
    WK9, WCout = rhs_bf16.shape
    K9 = WK9 // W                                               # 9 * Cin
    Cout = WCout // W
    KH = KW = 3
    assert K9 == KH * KW * Cin

    # ---- glue: done ONCE on the fused tensor, inside the same jit ----------
    x = jnp.transpose(x_nchw, (0, 2, 3, 1))                     # NCHW -> NHWC
    x = jnp.pad(x, ((0, 0), (1, 1), (1, 1), (0, 0)))            # pad = 1
    # im2col: taps ordered (kh, kw) major, ci minor — matches weight.reshape.
    taps = [x[:, kh:kh + H, kw:kw + W, :]
            for kh in range(KH) for kw in range(KW)]            # 9 x (B,H,W,Cin)
    patches = jnp.concatenate(taps, axis=-1)                    # (B,H,W,9*Cin)
    lhs = patches.reshape(B * H, W * K9).astype(jnp.bfloat16)   # bf16 MXU operand

    # ---- row tiling over the fused (B*H) axis -------------------------------
    rows = B * H
    rows8 = ((rows + 7) // 8) * 8
    if rows8 != rows:
        lhs = jnp.pad(lhs, ((0, rows8 - rows), (0, 0)))
    rb = _pick_row_block(rows8, WK9 * 2)                        # bf16 bytes/row
    grid = (rows8 // rb,)

    out_flat = pl.pallas_call(
        _conv_bias_relu_kernel,
        out_shape=jax.ShapeDtypeStruct((rows8, WCout), jnp.float32),
        grid_spec=pltpu.PrefetchScalarGridSpec(
            num_scalar_prefetch=0,
            grid=grid,
            in_specs=[
                pl.BlockSpec((rb, WK9), lambda i: (i, 0)),
                pl.BlockSpec((WK9, WCout), lambda i: (0, 0)),   # resident weight
                pl.BlockSpec((1, WCout), lambda i: (0, 0)),     # resident bias
            ],
            out_specs=pl.BlockSpec((rb, WCout), lambda i: (i, 0)),
        ),
        compiler_params=pltpu.CompilerParams(
            dimension_semantics=("parallel",)),
    )(lhs, rhs_bf16, b2)

    out = out_flat[:rows].reshape(B, H, W, Cout)
    # Keep NCHW to preserve the original nn.Conv2d output layout.
    return jnp.transpose(out, (0, 3, 1, 2))                     # NHWC -> NCHW


@jax.jit
def siamese_net_forward(x_list, rhs_bf16, b2):
    """SiameseNet.forward: apply the SAME inner net (shared weights) to each
    tensor in x_list. All list elements are fused into a single pallas_call."""
    L = len(x_list)
    xs = jnp.stack(x_list, axis=0)                  # (L, N, Cin, H, W)
    _, N, Cin, H, W = xs.shape
    fused = _inner_net_pallas(xs.reshape(L * N, Cin, H, W), rhs_bf16, b2)
    return [fused[l * N:(l + 1) * N] for l in range(L)]


if __name__ == "__main__":
    key = jax.random.PRNGKey(0)
    k_x1, k_x2, k_w, k_b = jax.random.split(key, 4)

    N, Cin, H, W = 2, 4, 16, 16
    Cout = 8

    # Siamese input: a list of two tensors, each NCHW.
    x_list = [
        jax.random.normal(k_x1, (N, Cin, H, W), dtype=jnp.float32),
        jax.random.normal(k_x2, (N, Cin, H, W), dtype=jnp.float32),
    ]

    # Shared parameters of the inner net (HWIO conv weights).
    weight = 0.1 * jax.random.normal(k_w, (3, 3, Cin, Cout), dtype=jnp.float32)
    bias = 0.01 * jax.random.normal(k_b, (Cout,), dtype=jnp.float32)

    # Parameter setup: build the block-diagonal bf16 weight + tiled bias ONCE.
    rhs_bf16, b2 = prepare_siamese_params(weight, bias, W)

    outs = siamese_net_forward(x_list, rhs_bf16, b2)
    outs = [jax.block_until_ready(o) for o in outs]

    # Reference check against XLA conv to validate kernel semantics.
    def ref_inner(x):
        y = jax.lax.conv_general_dilated(
            x, weight, window_strides=(1, 1), padding=((1, 1), (1, 1)),
            dimension_numbers=("NCHW", "HWIO", "NCHW"))
        return jnp.maximum(y + bias.reshape(1, Cout, 1, 1), 0.0)

    ok = True
    for x, o in zip(x_list, outs):
        r = ref_inner(x)
        # bf16 matmul operands (f32 accumulation) -> relaxed tolerance.
        ok = ok and bool(jnp.allclose(o, r, atol=2e-2, rtol=2e-2))
        ok = ok and (o.shape == (N, Cout, H, W))

    if ok:
        print("KERNEL_OK")
    else:
        print("KERNEL_MISMATCH")
</pallas_src>

<mosaic_0001>
module attributes {stable_mosaic.version = 11 : i64} {
  func.func @_conv_bias_relu_kernel(%arg0: i32, %arg1: memref<64x576xbf16, #tpu.memory_space<vmem>>, %arg2: memref<576x128xbf16, #tpu.memory_space<vmem>>, %arg3: memref<1x128xf32, #tpu.memory_space<vmem>>, %arg4: memref<64x128xf32, #tpu.memory_space<vmem>>) attributes {dimension_semantics = [#tpu.dimension_semantics<parallel>], iteration_bounds = array<i64: 1>, scalar_prefetch = 0 : i64, scratch_operands = 0 : i64, tpu.core_type = #tpu.core_type<tc>, window_params = [{transform_indices = @transform_0, window_bounds = array<i64: 64, 576>}, {pipeline_mode = #tpu.pipeline_mode<synchronous>, transform_indices = @transform_1, window_bounds = array<i64: 576, 128>}, {pipeline_mode = #tpu.pipeline_mode<synchronous>, transform_indices = @transform_2, window_bounds = array<i64: 1, 128>}, {transform_indices = @transform_3, window_bounds = array<i64: 64, 128>}]} {
    %c0 = arith.constant 0 : index
    %c0_0 = arith.constant 0 : index
    %0 = vector.load %arg1[%c0, %c0_0] : memref<64x576xbf16, #tpu.memory_space<vmem>>, vector<64x576xbf16>
    %c0_1 = arith.constant 0 : index
    %c0_2 = arith.constant 0 : index
    %1 = vector.load %arg2[%c0_1, %c0_2] : memref<576x128xbf16, #tpu.memory_space<vmem>>, vector<576x128xbf16>
    %cst = arith.constant dense<0.000000e+00> : vector<64x128xf32>
    %2 = tpu.matmul %0, %1, %cst {dimension_numbers = #tpu.dot_dimension_numbers<[1], [0], [0], [1], [0, 0, 1, 1], [], []>} : vector<64x576xbf16>, vector<576x128xbf16>, vector<64x128xf32> -> vector<64x128xf32>
    %c0_3 = arith.constant 0 : index
    %c0_4 = arith.constant 0 : index
    %3 = vector.load %arg3[%c0_3, %c0_4] : memref<1x128xf32, #tpu.memory_space<vmem>>, vector<1x128xf32>
    %4 = vector.broadcast %3 : vector<1x128xf32> to vector<64x128xf32>
    %5 = arith.addf %2, %4 : vector<64x128xf32>
    %cst_5 = arith.constant 0.000000e+00 : f32
    %6 = vector.broadcast %cst_5 : f32 to vector<64x128xf32>
    %7 = arith.maximumf %5, %6 : vector<64x128xf32>
    %c0_6 = arith.constant 0 : index
    %c0_7 = arith.constant 0 : index
    %8 = vector.load %arg4[%c0_6, %c0_7] : memref<64x128xf32, #tpu.memory_space<vmem>>, vector<64x128xf32>
    tpu.vector_store %arg4[%c0_6, %c0_7], %7 {strides = array<i32>} : memref<64x128xf32, #tpu.memory_space<vmem>>, vector<64x128xf32>,
    return
  }
  func.func @transform_0(%arg0: i32) -> (i32, i32) {
    %c0_i32 = arith.constant 0 : i32
    %c0_i32_0 = arith.constant 0 : i32
    return %arg0, %c0_i32 : i32, i32
  }
  func.func @transform_1(%arg0: i32) -> (i32, i32) {
    %c0_i32 = arith.constant 0 : i32
    %c0_i32_0 = arith.constant 0 : i32
    %c0_i32_1 = arith.constant 0 : i32
    return %c0_i32, %c0_i32_0 : i32, i32
  }
  func.func @transform_2(%arg0: i32) -> (i32, i32) {
    %c0_i32 = arith.constant 0 : i32
    %c0_i32_0 = arith.constant 0 : i32
    %c0_i32_1 = arith.constant 0 : i32
    return %c0_i32, %c0_i32_0 : i32, i32
  }
  func.func @transform_3(%arg0: i32) -> (i32, i32) {
    %c0_i32 = arith.constant 0 : i32
    %c0_i32_0 = arith.constant 0 : i32
    return %arg0, %c0_i32 : i32, i32
  }
}

</mosaic_0001>

<bundles_post_ra>
// kernel: siamese_net_forward.1
= control target key start
LH: loop header
LB: loop body
LE: loop exit
PB: predicated region body
PF: predicated region fallthrough
CT: control target
= control target key end

     0   :  { %vm434_vm0 = vcmask 523264   ;;  %s1114_s1 = inlined_call_operand.vmem [shape: bf16[576,128], index: 1, kind: input, shape index: {}]   ;;  %s1115_s0 = inlined_call_operand.vmem [shape: bf16[64,576], index: 0, kind: input, shape index: {}]   ;;  %s1116_s2 = inlined_call_operand.vmem [shape: f32[1,128], index: 2, kind: input, shape index: {}]   ;;  %s1117_s3 = inlined_call_operand.vmem [shape: f32[64,128], index: 3, kind: output, shape index: {}]  }
   0x1   :  { %v835_v0 = vld [vmem:[%s1114_s1 + $0x78] sm:$0xff]   ;;  %v839_v4 = vld [vmem:[%s1114_s1 + $0x70] sm:$0xff]   ;;  %v843_v8 = vld [vmem:[%s1114_s1 + $0x68] sm:$0xff]  }
   0x2   :  { %v836_v1 = vld [vmem:[%s1114_s1 + $0xf8] sm:$0xff]   ;;  %723 = vmatprep.subr.bf16.mxu0 %v835_v0  ;;  %v840_v5 = vld [vmem:[%s1114_s1 + $0xf0] sm:$0xff]   ;;  %v844_v9 = vld [vmem:[%s1114_s1 + $0xe8] sm:$0xff]  }
   0x3   :  { %v837_v2 = vld [vmem:[%s1114_s1 + $0x38] sm:$0xff]   ;;  %763 = vmatprep.subr.bf16.mxu1 %v836_v1  ;;  %v841_v6 = vld [vmem:[%s1114_s1 + $0x30] sm:$0xff]   ;;  %v845_v10 = vld [vmem:[%s1114_s1 + $0x28] sm:$0xff]  }
   0x4   :  { %v838_v3 = vld [vmem:[%s1114_s1 + $0xb8] sm:$0xff]   ;;  %724 = vmatpush3.bf16.msra.mxu0 %v837_v2  ;;  %v842_v7 = vld [vmem:[%s1114_s1 + $0xb0] sm:$0xff]   ;;  %v846_v11 = vld [vmem:[%s1114_s1 + $0xa8] sm:$0xff]  }
   0x5   :  { %764 = vmatpush3.bf16.msra.mxu1 %v838_v3  ;;  %725 = vmatprep.subr.bf16.mxu0 %v839_v4  ;;  %v847_v12 = vld [vmem:[%s1114_s1 + $0x60] sm:$0xff]   ;;  %v851_v16 = vld [vmem:[%s1114_s1 + $0x58] sm:$0xff]   ;;  %v855_v20 = vld [vmem:[%s1114_s1 + $0x50] sm:$0xff]  }
   0x6   :  { %765 = vmatprep.subr.bf16.mxu1 %v840_v5  ;;  %v848_v13 = vld [vmem:[%s1114_s1 + $0xe0] sm:$0xff]   ;;  %v852_v17 = vld [vmem:[%s1114_s1 + $0xd8] sm:$0xff]   ;;  %v856_v21 = vld [vmem:[%s1114_s1 + $0xd0] sm:$0xff]  }
   0x7   :  { %v849_v14 = vld [vmem:[%s1114_s1 + $0x20] sm:$0xff]   ;;  %v853_v18 = vld [vmem:[%s1114_s1 + $0x18] sm:$0xff]   ;;  %v857_v22 = vld [vmem:[%s1114_s1 + $0x10] sm:$0xff]  }
   0x8   :  { %726 = vmatpush3.bf16.msra.mxu0 %v841_v6  ;;  %v850_v15 = vld [vmem:[%s1114_s1 + $0xa0] sm:$0xff]   ;;  %v854_v19 = vld [vmem:[%s1114_s1 + $0x98] sm:$0xff]   ;;  %v858_v23 = vld [vmem:[%s1114_s1 + $0x90] sm:$0xff]  }
   0x9   :  { %766 = vmatpush3.bf16.msra.mxu1 %v842_v7  ;;  %727 = vmatprep.subr.bf16.mxu0 %v843_v8  ;;  %v859_v24 = vld [vmem:[%s1114_s1 + $0x48] sm:$0xff]   ;;  %v863_v28 = vld [vmem:[%s1114_s1 + $0x40] sm:$0xff]   ;;  %v873_v36 = vld [vmem:[%s1114_s1 + $0x118] sm:$0xff]  }
   0xa   :  { %767 = vmatprep.subr.bf16.mxu1 %v844_v9  ;;  %v860_v25 = vld [vmem:[%s1114_s1 + $0xc8] sm:$0xff]   ;;  %v864_v29 = vld [vmem:[%s1114_s1 + $0xc0] sm:$0xff]   ;;  %v880_v39 = vld [vmem:[%s1114_s1 + $0x110] sm:$0xff]  }
   0xb   :  { %v861_v26 = vld [vmem:[%s1114_s1 + $0x8] sm:$0xff]   ;;  %v865_v30 = vld [vmem:[%s1114_s1] sm:$0xff]   ;;  %v883_v43 = vld [vmem:[%s1115_s0 + $0x5c] ss:$20 sps:$4 sm:$0xff]  }
   0xc   :  { %728 = vmatpush3.bf16.msra.mxu0 %v845_v10  ;;  %v862_v27 = vld [vmem:[%s1114_s1 + $0x88] sm:$0xff]   ;;  %v866_v31 = vld [vmem:[%s1114_s1 + $0x80] sm:$0xff]   ;;  %v888_v48 = vld [vmem:[%s1115_s0 + $0x7c] ss:$20 sps:$4 sm:$0xff]  }
   0xd   :  { %768 = vmatpush3.bf16.msra.mxu1 %v846_v11  ;;  %729 = vmatprep.subr.bf16.mxu0 %v847_v12  ;;  %v867_v32 = vld [vmem:[%s1115_s0] ss:$20 sps:$4 sm:$0xff]   ;;  %v869_v33 = vld [vmem:[%s1115_s0 + $0x4] ss:$20 sps:$4 sm:$0xff]   ;;  %v870_v34 = vld [vmem:[%s1115_s0 + $0x8] ss:$20 sps:$4 sm:$0xff]  }
   0xe   :  { %769 = vmatprep.subr.bf16.mxu1 %v848_v13  ;;  %v872_v35 = vld [vmem:[%s1115_s0 + $0xc] ss:$20 sps:$4 sm:$0xff]   ;;  %479 = vmatprep.mubr.bf16.mxu0 %v869_v33  ;;  %v876_v38 = vld [vmem:[%s1115_s0 + $0x34] ss:$20 sps:$4 sm:$0xff]   ;;  %v879_v41 = vld [vmem:[%s1115_s0 + $0x30] ss:$20 sps:$4 sm:$0xff]  }
   0xf   :  { %544 = vmatprep.mubr.bf16.mxu1 %v872_v35  ;;  %v874_v37 = vld [vmem:[%s1115_s0 + $0x2c] ss:$20 sps:$4 sm:$0xff]   ;;  %v878_v40 = vld [vmem:[%s1115_s0 + $0x28] ss:$20 sps:$4 sm:$0xff]   ;;  %v885_v46 = vld [vmem:[%s1115_s0 + $0x50] ss:$20 sps:$4 sm:$0xff]  }
  0x10   :  { %730 = vmatpush3.bf16.msra.mxu0 %v849_v14  ;;  %v881_v42 = vld [vmem:[%s1115_s0 + $0x54] ss:$20 sps:$4 sm:$0xff]   ;;  %v894_v45 = vld [vmem:[%s1114_s1 + $0x100] sm:$0xff]   ;;  %v886_v47 = vld [vmem:[%s1115_s0 + $0x58] ss:$20 sps:$4 sm:$0xff]  }
  0x11   :  { %770 = vmatpush3.bf16.msra.mxu1 %v850_v15  ;;  %731 = vmatprep.subr.bf16.mxu0 %v851_v16  ;;  %v887_v44 = vld [vmem:[%s1114_s1 + $0x108] sm:$0xff]   ;;  %v890_v49 = vld [vmem:[%s1115_s0 + $0x84] ss:$20 sps:$4 sm:$0xff]   ;;  %v893_v51 = vld [vmem:[%s1115_s0 + $0x80] ss:$20 sps:$4 sm:$0xff]  }
  0x12   :  { %771 = vmatprep.subr.bf16.mxu1 %v852_v17  ;;  %v892_v50 = vld [vmem:[%s1115_s0 + $0x78] ss:$20 sps:$4 sm:$0xff]   ;;  %v895_v52 = vld [vmem:[%s1115_s0 + $0x10] ss:$20 sps:$4 sm:$0xff]   ;;  %v896_v53 = vld [vmem:[%s1115_s0 + $0x60] ss:$20 sps:$4 sm:$0xff]  }
  0x13   :  { %v897_v54 = vld [vmem:[%s1115_s0 + $0x38] ss:$20 sps:$4 sm:$0xff]   ;;  %v898_v55 = vld [vmem:[%s1115_s0 + $0x88] ss:$20 sps:$4 sm:$0xff]  }
  0x14   :  { %732 = vmatpush3.bf16.msra.mxu0 %v853_v18 }
  0x15   :  { %772 = vmatpush3.bf16.msra.mxu1 %v854_v19  ;;  %733 = vmatprep.subr.bf16.mxu0 %v855_v20  ;;  %v662_v19 = vld [vmem:[%s1116_s2] ss:$0 sm:$0xff] }
  0x16   :  { %773 = vmatprep.subr.bf16.mxu1 %v856_v21 }
  0x18   :  { %734 = vmatpush3.bf16.msra.mxu0 %v857_v22 }
  0x19   :  { %774 = vmatpush3.bf16.msra.mxu1 %v858_v23  ;;  %735 = vmatprep.subr.bf16.mxu0 %v859_v24 }
  0x1a   :  { %775 = vmatprep.subr.bf16.mxu1 %v860_v25 }
  0x1c   :  { %736 = vmatpush3.bf16.msra.mxu0 %v861_v26 }
  0x1d   :  { %776 = vmatpush3.bf16.msra.mxu1 %v862_v27  ;;  %737 = vmatprep.subr.bf16.mxu0 %v863_v28 }
  0x1e   :  { %777 = vmatprep.subr.bf16.mxu1 %v864_v29 }
  0x20   :  { %738 = vmatpush3.bf16.msra.mxu0 %v865_v30 }
  0x21   :  { %778 = vmatpush3.bf16.msra.mxu1 %v866_v31  ;;  %811 = vmatprep.subr.bf16.mxu0 %v873_v36 }
  0x22   :  { %827 = vmatprep.subr.bf16.mxu1 %v873_v36 }
  0x23   :  { %480 = vmatmul.mubr.bf16.vlgmr.msra.gmra.mxu0 %v867_v32 }
  0x24   :  { %545 = vmatmul.mubr.bf16.vlgmr.msra.gmra.mxu1 %v870_v34  ;;  %812 = vmatpush3.bf16.msra.mxu0 %v873_v36 }
  0x25   :  { %831 = vmatpush3.bf16.msra.mxu1 %v873_v36  ;;  %487 = vmatprep.mubr.bf16.mxu0 %v874_v37 }
  0x26   :  { %552 = vmatprep.mubr.bf16.mxu1 %v876_v38  ;;  %813 = vmatprep.subr.bf16.mxu0 %v880_v39 }
  0x27   :  { %828 = vmatprep.subr.bf16.mxu1 %v880_v39 }
  0x28   :  { %814 = vmatpush3.bf16.msra.mxu0 %v880_v39 }
  0x29   :  { %832 = vmatpush3.bf16.msra.mxu1 %v880_v39  ;;  %815 = vmatprep.subr.bf16.mxu0 %v887_v44 }
  0x2a   :  { %829 = vmatprep.subr.bf16.mxu1 %v887_v44 }
  0x2b   :  { %488 = vmatmul.mubr.bf16.gmra.mxu0 %v878_v40 }
  0x2c   :  { %553 = vmatmul.mubr.bf16.gmra.mxu1 %v879_v41  ;;  %495 = vmatprep.mubr.bf16.mxu0 %v881_v42 }
  0x2d   :  { %560 = vmatprep.mubr.bf16.mxu1 %v883_v43  ;;  %816 = vmatpush3.bf16.msra.mxu0 %v887_v44 }
  0x2e   :  { %833 = vmatpush3.bf16.msra.mxu1 %v887_v44  ;;  %817 = vmatprep.subr.bf16.mxu0 %v894_v45 }
  0x2f   :  { %830 = vmatprep.subr.bf16.mxu1 %v894_v45 }
  0x31   :  { %818 = vmatpush3.bf16.msra.mxu0 %v894_v45 }
  0x32   :  { %834 = vmatpush3.bf16.msra.mxu1 %v894_v45 }
  0x33   :  { %496 = vmatmul.mubr.bf16.gmra.mxu0 %v885_v46 }
  0x34   :  { %561 = vmatmul.mubr.bf16.gmra.mxu1 %v886_v47  ;;  %503 = vmatprep.mubr.bf16.mxu0 %v888_v48 }
  0x35   :  { %568 = vmatprep.mubr.bf16.mxu1 %v890_v49 }
  0x3b   :  { %504 = vmatmul.mubr.bf16.gmra.mxu0 %v892_v50 }
  0x3c   :  { %569 = vmatmul.mubr.bf16.gmra.mxu1 %v893_v51  ;;  %819 = vmatprep.mubr.msk.bf16.mxu0 %vm434_vm0, %v895_v52 }
  0x3d   :  { %823 = vmatprep.mubr.msk.bf16.mxu1 %vm434_vm0, %v896_v53 }
  0x43   :  { %820 = vmatmul.mubr.msk.bf16.vlgmr.msra.gmra.mxu0 %vm434_vm0, %v897_v54 }
  0x44   :  { %824 = vmatmul.mubr.msk.bf16.vlgmr.msra.gmra.mxu1 %vm434_vm0, %v898_v55 }
  0xe3   :  { %v739_v56 = vpop.f32.mrf.mxu0 }
  0xe4   :  { %v779_v57 = vpop.f32.mrf.mxu1 }
  0xe5   :  { %v740_v58 = vpop.f32.mrf.mxu0 }
  0xe6   :  { %v780_v59 = vpop.f32.mrf.mxu1  ;;  %v741_v17 = vadd.f32 %v740_v58, %v739_v56 }
  0xe7   :  { %v742_v60 = vpop.f32.mrf.mxu0  ;;  %v781_v34 = vadd.f32 %v780_v59, %v779_v57 }
  0xe8   :  { %v782_v61 = vpop.f32.mrf.mxu1  ;;  %v482_v27 = vadd.f32 %v741_v17, %v662_v19 }
  0xe9   :  { %v743_v62 = vpop.f32.mrf.mxu0 }
  0xea   :  { %v783_v63 = vpop.f32.mrf.mxu1  ;;  %v744_v28 = vadd.f32 %v743_v62, %v742_v60  ;;  %v547_v46 = vadd.f32 %v781_v34, %v482_v27 }
  0xeb   :  { %v745_v0 = vpop.f32.mrf.mxu0  ;;  %v784_v52 = vadd.f32 %v783_v63, %v782_v61 }
  0xec   :  { %v785_v1 = vpop.f32.mrf.mxu1  ;;  %v485_v43 = vadd.f32 %v744_v28, %v662_v19 }
  0xed   :  { %v746_v2 = vpop.f32.mrf.mxu0 }
  0xee   :  { %v786_v3 = vpop.f32.mrf.mxu1  ;;  %v747_v15 = vadd.f32 %v746_v2, %v745_v0  ;;  %v550_v63 = vadd.f32 %v784_v52, %v485_v43 }
  0xef   :  { %v748_v4 = vpop.f32.mrf.mxu0  ;;  %v787_v30 = vadd.f32 %v786_v3, %v785_v1 }
  0xf0   :  { %v788_v5 = vpop.f32.mrf.mxu1  ;;  %v490_v23 = vadd.f32 %v747_v15, %v662_v19 }
  0xf1   :  { %v749_v6 = vpop.f32.mrf.mxu0 }
  0xf2   :  { %v789_v7 = vpop.f32.mrf.mxu1  ;;  %v750_v24 = vadd.f32 %v749_v6, %v748_v4  ;;  %v555_v41 = vadd.f32 %v787_v30, %v490_v23 }
  0xf3   :  { %v751_v8 = vpop.f32.mrf.mxu0  ;;  %v790_v47 = vadd.f32 %v789_v7, %v788_v5 }
  0xf4   :  { %v791_v9 = vpop.f32.mrf.mxu1  ;;  %v493_v38 = vadd.f32 %v750_v24, %v662_v19 }
  0xf5   :  { %v752_v10 = vpop.f32.mrf.mxu0 }
  0xf6   :  { %v792_v11 = vpop.f32.mrf.mxu1  ;;  %v753_v21 = vadd.f32 %v752_v10, %v751_v8  ;;  %v558_v60 = vadd.f32 %v790_v47, %v493_v38 }
  0xf7   :  { %v754_v12 = vpop.f32.mrf.mxu0  ;;  %v793_v44 = vadd.f32 %v792_v11, %v791_v9 }
  0xf8   :  { %v794_v13 = vpop.f32.mrf.mxu1  ;;  %v498_v35 = vadd.f32 %v753_v21, %v662_v19 }
  0xf9   :  { %v755_v14 = vpop.f32.mrf.mxu0 }
  0xfa   :  { %v795_v16 = vpop.f32.mrf.mxu1  ;;  %v756_v36 = vadd.f32 %v755_v14, %v754_v12  ;;  %v563_v56 = vadd.f32 %v793_v44, %v498_v35 }
  0xfb   :  { %v757_v18 = vpop.f32.mrf.mxu0  ;;  %v796_v0 = vadd.f32 %v795_v16, %v794_v13 }
  0xfc   :  { %v797_v20 = vpop.f32.mrf.mxu1  ;;  %v501_v53 = vadd.f32 %v756_v36, %v662_v19 }
  0xfd   :  { %v758_v22 = vpop.f32.mrf.mxu0 }
  0xfe   :  { %v759_v25 = vadd.f32 %v758_v22, %v757_v18  ;;  %v798_v26 = vpop.f32.mrf.mxu1  ;;  %v566_v9 = vadd.f32 %v796_v0, %v501_v53 }
  0xff   :  { %v760_v29 = vpop.f32.mrf.mxu0  ;;  %v799_v32 = vadd.f32 %v798_v26, %v797_v20 }
 0x100   :  { %v506_v31 = vadd.f32 %v759_v25, %v662_v19  ;;  %v800_v33 = vpop.f32.mrf.mxu1 }
 0x101   :  { %v761_v37 = vpop.f32.mrf.mxu0 }
 0x102   :  { %v762_v39 = vadd.f32 %v761_v37, %v760_v29  ;;  %v801_v40 = vpop.f32.mrf.mxu1  ;;  %v571_v42 = vadd.f32 %v799_v32, %v506_v31 }
 0x103   :  { %v821_v45 = vpop.f32.mrf.mxu0  ;;  %v802_v49 = vadd.f32 %v801_v40, %v800_v33 }
 0x104   :  { %v509_v48 = vadd.f32 %v762_v39, %v662_v19  ;;  %v620_v50 = vadd.f32 %v821_v45, %v555_v41  ;;  %v825_v51 = vpop.f32.mrf.mxu1 }
 0x105   :  { %v636_v54 = vadd.f32 %v825_v51, %v571_v42  ;;  %v611_v55 = vpop.f32.mrf.mxu0 }
 0x106   :  { %v644_v57 = vmax.f32 %v620_v50, 0.0  ;;  %v612_v58 = vadd.f32 %v611_v55, %v547_v46  ;;  %v627_v59 = vpop.f32.mrf.mxu1  ;;  %v574_v62 = vadd.f32 %v802_v49, %v509_v48 }
 0x107   :  { %v648_v1 = vmax.f32 %v636_v54, 0.0  ;;  %v628_v2 = vadd.f32 %v627_v59, %v563_v56  ;;  %v822_v3 = vpop.f32.mrf.mxu0 }
 0x108   :  { %652 = vst [vmem:[%s1117_s3 + $0x10] sm:$0xff] %v644_v57  ;;  %v642_v4 = vmax.f32 %v612_v58, 0.0  ;;  %v623_v5 = vadd.f32 %v822_v3, %v558_v60  ;;  %v826_v61 = vpop.f32.mrf.mxu1 }
 0x109   :  { %656 = vst [vmem:[%s1117_s3 + $0x30] sm:$0xff] %v648_v1  ;;  %v646_v6 = vmax.f32 %v628_v2, 0.0  ;;  %v639_v7 = vadd.f32 %v826_v61, %v574_v62  ;;  %v614_v8 = vpop.f32.mrf.mxu0 }
 0x10a   :  { %650 = vst [vmem:[%s1117_s3] sm:$0xff] %v642_v4  ;;  %v645_v10 = vmax.f32 %v623_v5, 0.0  ;;  %v615_v11 = vadd.f32 %v614_v8, %v550_v63  ;;  %v630_v12 = vpop.f32.mrf.mxu1 }
 0x10b   :  { %654 = vst [vmem:[%s1117_s3 + $0x20] sm:$0xff] %v646_v6  ;;  %v649_v13 = vmax.f32 %v639_v7, 0.0  ;;  %v631_v14 = vadd.f32 %v630_v12, %v566_v9 }
 0x10c   :  { %653 = vst [vmem:[%s1117_s3 + $0x18] sm:$0xff] %v645_v10  ;;  %v643_v15 = vmax.f32 %v615_v11, 0.0 }
 0x10d   :  { %657 = vst [vmem:[%s1117_s3 + $0x38] sm:$0xff] %v649_v13  ;;  %v647_v16 = vmax.f32 %v631_v14, 0.0 }
 0x10e   :  { %651 = vst [vmem:[%s1117_s3 + $0x8] sm:$0xff] %v643_v15 }
 0x10f   :  { %655 = vst [vmem:[%s1117_s3 + $0x28] sm:$0xff] %v647_v16 }

</bundles_post_ra>
